<compile_context>
chip_gen: v6e
topology: v6e:2x2x1
jax: 0.10.0
libtpu: 0.0.40
codegen_flags: <defaults>
</compile_context>

<pallas_src>
import jax
import jax.numpy as jnp
from jax.experimental import pallas as pl
from jax.experimental.pallas import tpu as pltpu


def _round_up(x, m):
    return ((x + m - 1) // m) * m


def _vmem_capacity_bytes():
    """Physical VMEM per core; falls back to the v5e/v6e value if the query fails."""
    try:
        return int(pltpu.get_tpu_info().vmem_capacity_bytes)
    except Exception:
        return 128 * 1024 * 1024


def pack_params(params):
    """Fuse the four Linears into one block-diagonal weight + one bias row.

    Returns:
      w_cat: (U+I, 2K) with K = E + 2;   b_cat: (1, 2K).  Both float32.
      Columns of each K-block: [E embedding dims | bias column | constant column].
    """
    wu, bu, wi, bi, wub, bub, wib, bib = [p.astype(jnp.float32) for p in params]
    U, E = wu.shape
    I = wi.shape[0]
    K = E + 2
    f32 = jnp.float32

    wu_aug = jnp.concatenate([wu, wub, jnp.zeros((U, 1), f32)], axis=1)   # (U, K)
    wi_aug = jnp.concatenate([wi, jnp.zeros((I, 1), f32), wib], axis=1)   # (I, K)
    bu_aug = jnp.concatenate([bu, bub, jnp.ones((1, 1), f32)], axis=1)    # (1, K)
    bi_aug = jnp.concatenate([bi, jnp.ones((1, 1), f32), bib], axis=1)    # (1, K)

    w_cat = jnp.concatenate(
        [jnp.concatenate([wu_aug, jnp.zeros((U, K), f32)], axis=1),
         jnp.concatenate([jnp.zeros((I, K), f32), wi_aug], axis=1)],
        axis=0)                                                            # (U+I, 2K)
    b_cat = jnp.concatenate([bu_aug, bi_aug], axis=1)                      # (1, 2K)
    return w_cat, b_cat


def _make_fm_kernel(U, I, K, fused):
    def kernel(u_ref, i_ref, w_ref, b_ref, out_ref):
        if fused:
            # Single MXU pass: [u | i] @ blockdiag(Wu_aug, Wi_aug) -> [u_aug | i_aug].
            x = jnp.concatenate([u_ref[...], i_ref[...]], axis=1)         # (TB, U+I)
            r = jnp.dot(x, w_ref[...], preferred_element_type=jnp.float32)
            r = r + b_ref[...]                                            # (TB, 2K) f32
            u_aug = r[:, :K]
            i_aug = r[:, K:]
        else:
            # Known-good fallback: two dots against static slices of the fused weight.
            u_aug = jnp.dot(u_ref[...], w_ref[:U, :K],
                            preferred_element_type=jnp.float32) + b_ref[:, :K]
            i_aug = jnp.dot(i_ref[...], w_ref[U:, K:],
                            preferred_element_type=jnp.float32) + b_ref[:, K:]

        # FM score: sum_k u_aug_k * i_aug_k == sum(u_emb*i_emb) + u_bias + i_bias.
        scores = jnp.sum(u_aug * i_aug, axis=1, keepdims=True)            # (TB, 1) f32

        # Lane-dense store: one contiguous (1, TB) row (XLU transpose) instead of a
        # (TB, 1) column of masked single-lane stores.
        out_ref[...] = scores.T

    return kernel


def torchfm_forward(u, i, params, *, block_batch=None):
    """Pallas implementation of TorchFM.forward.

    u: (B, U), i: (B, I).  float32 inputs follow the PyTorch f32 path exactly;
    bf16 inputs (exact for 0/1 many-hot features) are streamed and multiplied
    as native bf16 on the MXU with f32 accumulation.  Returns scores of shape
    (B,), like the PyTorch module.
    """
    if u.ndim == 1:
        u = u.reshape(1, -1)
    if i.ndim == 1:
        i = i.reshape(1, -1)
    assert u.shape[0] == i.shape[0], "u and i must share the batch dimension"

    # PyTorch casts to f32; we additionally allow an opt-in bf16 fast path.
    if u.dtype == jnp.bfloat16 and i.dtype == jnp.bfloat16:
        feat_dtype = jnp.bfloat16
    else:
        feat_dtype = jnp.float32
    u = u.astype(feat_dtype)
    i = i.astype(feat_dtype)

    w_cat, b_cat = pack_params(params)             # f32 (U+I, 2K), (1, 2K)
    if feat_dtype == jnp.bfloat16:
        w_cat = w_cat.astype(jnp.bfloat16)         # native bf16 MXU, f32 accumulation
    # Bias row stays f32 (added after the f32-accumulated matmul).

    B, U = u.shape
    _, I = i.shape
    K2 = w_cat.shape[1]
    K = K2 // 2
    assert w_cat.shape[0] == U + I

    vmem_cap = _vmem_capacity_bytes()
    if block_batch is None:
        # Per-generation default: parts with <=64 MiB VMEM (v7x) get half the tile.
        block_batch = 8192 if vmem_cap > 64 * 1024 * 1024 else 4096

    if B <= min(block_batch, 1024):
        TB = B                                     # single full tile, no grid overhead
    else:
        # Multiple-of-128 tile (lane-dense output blocks), capped at ceil(B/2) so the
        # grid always has >= 2 steps and both v7x TensorCores stay busy.
        TB = min(_round_up(block_batch, 128),
                 max(128, _round_up(pl.cdiv(B, 2), 128)))
    num_tiles = pl.cdiv(B, TB)
    # No wrapper-side jnp.pad: partial trailing blocks are handled by Pallas, and the
    # padded rows only affect their own scores, which never get written past B.

    vmem_limit = max(32 * 1024 * 1024,
                     min(vmem_cap - 16 * 1024 * 1024, 64 * 1024 * 1024))

    flops = 2 * B * (U + I) * K2 + 4 * B * K
    bytes_accessed = (B * (U * u.dtype.itemsize + I * i.dtype.itemsize)
                      + B * 4
                      + w_cat.size * w_cat.dtype.itemsize + b_cat.size * 4)

    def attempt(fused, buffered):
        if buffered:
            feat_kw = dict(pipeline_mode=pl.Buffered(3))   # deeper input buffering
            res_kw = dict(pipeline_mode=pl.Buffered(1))    # fetched once, revisited
        else:
            feat_kw, res_kw = {}, {}
        return pl.pallas_call(
            _make_fm_kernel(U, I, K, fused=fused),
            out_shape=jax.ShapeDtypeStruct((1, B), jnp.float32),
            grid=(num_tiles,),
            in_specs=[
                pl.BlockSpec((TB, U), lambda b: (b, 0), **feat_kw),      # streamed
                pl.BlockSpec((TB, I), lambda b: (b, 0), **feat_kw),      # streamed
                pl.BlockSpec((U + I, K2), lambda b: (0, 0), **res_kw),   # resident
                pl.BlockSpec((1, K2), lambda b: (0, 0), **res_kw),       # resident
            ],
            out_specs=pl.BlockSpec((1, TB), lambda b: (0, b)),           # lane-dense
            compiler_params=pltpu.CompilerParams(
                dimension_semantics=("parallel",),   # shard batch tiles over TCs
                vmem_limit_bytes=int(vmem_limit),
            ),
            cost_estimate=pl.CostEstimate(
                flops=flops, transcendentals=0, bytes_accessed=bytes_accessed),
        )(u, i, w_cat, b_cat)

    # Best-effort ladder: fused single-dot + tuned buffering first, then
    # progressively simpler, previously-validated variants.
    out, last_err = None, None
    for fused, buffered in ((True, True), (True, False), (False, False)):
        try:
            out = attempt(fused, buffered)
            break
        except Exception as e:   # pragma: no cover — robustness fallback
            last_err = e
            out = None
    if out is None:
        raise last_err

    return out[0]   # (B,), matching the PyTorch module's return


def init_params(key, user_input_dim, item_input_dim, embedding_dim=8):
    """Deterministic parameter init (PyTorch-Linear-like uniform ranges).

    Weights are stored pre-transposed as (in, out); biases as (1, out) rows.
    """
    ks = jax.random.split(key, 8)

    def lin(kw, kb, fan_in, fan_out):
        bound = 1.0 / jnp.sqrt(fan_in)
        w = jax.random.uniform(kw, (fan_in, fan_out), jnp.float32, -bound, bound)
        b = jax.random.uniform(kb, (1, fan_out), jnp.float32, -bound, bound)
        return w, b

    wu, bu = lin(ks[0], ks[1], user_input_dim, embedding_dim)
    wi, bi = lin(ks[2], ks[3], item_input_dim, embedding_dim)
    wub, bub = lin(ks[4], ks[5], user_input_dim, 1)
    wib, bib = lin(ks[6], ks[7], item_input_dim, 1)
    return wu, bu, wi, bi, wub, bub, wib, bib


def _reference(u, i, params):
    wu, bu, wi, bi, wub, bub, wib, bib = params
    u_emb = u @ wu + bu
    i_emb = i @ wi + bi
    u_bias = (u @ wub + bub)[:, 0]
    i_bias = (i @ wib + bib)[:, 0]
    return (u_emb * i_emb).sum(axis=1) + u_bias + i_bias


if __name__ == "__main__":
    key = jax.random.PRNGKey(0)
    ku, ki, kp, kb = jax.random.split(key, 4)

    U, I, E = 16, 24, 8
    params = init_params(kp, U, I, E)

    # --- 1) Small batch, f32 end-to-end (faithful to the PyTorch f32 forward). ---
    B1 = 8
    u1 = (jax.random.uniform(ku, (B1, U)) > 0.5).astype(jnp.float32)
    i1 = (jax.random.uniform(ki, (B1, I)) > 0.5).astype(jnp.float32)
    s1 = torchfm_forward(u1, i1, params)
    jax.block_until_ready(s1)
    r1 = _reference(u1, i1, params)
    assert s1.shape == (B1,)
    assert jnp.allclose(s1, r1, atol=1e-4, rtol=1e-4), float(jnp.max(jnp.abs(s1 - r1)))

    # --- 2) Multi-tile grid + partial trailing block + bf16 MXU fast path. ---
    B2 = 300
    k1, k2 = jax.random.split(kb)
    u2 = (jax.random.uniform(k1, (B2, U)) > 0.5).astype(jnp.bfloat16)
    i2 = (jax.random.uniform(k2, (B2, I)) > 0.5).astype(jnp.bfloat16)
    # Pre-round parameters to bf16-representable values so the kernel (bf16 MXU,
    # f32 accumulation) and the f32 reference agree tightly.
    params_q = tuple(p.astype(jnp.bfloat16).astype(jnp.float32) for p in params)
    s2 = torchfm_forward(u2, i2, params_q, block_batch=128)
    jax.block_until_ready(s2)
    r2 = _reference(u2.astype(jnp.float32), i2.astype(jnp.float32), params_q)
    assert s2.shape == (B2,)
    assert jnp.allclose(s2, r2, atol=1e-3, rtol=1e-3), float(jnp.max(jnp.abs(s2 - r2)))

    print("KERNEL_OK")
</pallas_src>

<mosaic_0001>
module attributes {stable_mosaic.version = 11 : i64} {
  func.func @kernel(%arg0: i32, %arg1: memref<8x16xf32, #tpu.memory_space<vmem>>, %arg2: memref<8x24xf32, #tpu.memory_space<vmem>>, %arg3: memref<40x20xf32, #tpu.memory_space<vmem>>, %arg4: memref<1x20xf32, #tpu.memory_space<vmem>>, %arg5: memref<1x8xf32, #tpu.memory_space<vmem>>) attributes {dimension_semantics = [#tpu.dimension_semantics<parallel>], iteration_bounds = array<i64: 1>, scalar_prefetch = 0 : i64, scratch_operands = 0 : i64, tpu.core_type = #tpu.core_type<tc>, window_params = [{transform_indices = @transform_0, window_bounds = array<i64: 8, 16>}, {transform_indices = @transform_1, window_bounds = array<i64: 8, 24>}, {pipeline_mode = #tpu.pipeline_mode<synchronous>, transform_indices = @transform_2, window_bounds = array<i64: 40, 20>}, {pipeline_mode = #tpu.pipeline_mode<synchronous>, transform_indices = @transform_3, window_bounds = array<i64: 1, 20>}, {transform_indices = @transform_4, window_bounds = array<i64: 1, 8>}]} {
    %c0 = arith.constant 0 : index
    %c0_0 = arith.constant 0 : index
    %0 = vector.load %arg1[%c0, %c0_0] : memref<8x16xf32, #tpu.memory_space<vmem>>, vector<8x16xf32>
    %c0_1 = arith.constant 0 : index
    %c0_2 = arith.constant 0 : index
    %1 = vector.load %arg2[%c0_1, %c0_2] : memref<8x24xf32, #tpu.memory_space<vmem>>, vector<8x24xf32>
    %2 = tpu.concatenate %0, %1 in 1 : vector<8x16xf32>, vector<8x24xf32> -> vector<8x40xf32>
    %c0_3 = arith.constant 0 : index
    %c0_4 = arith.constant 0 : index
    %3 = vector.load %arg3[%c0_3, %c0_4] : memref<40x20xf32, #tpu.memory_space<vmem>>, vector<40x20xf32>
    %cst = arith.constant dense<0.000000e+00> : vector<8x20xf32>
    %4 = tpu.matmul %2, %3, %cst {dimension_numbers = #tpu.dot_dimension_numbers<[1], [0], [0], [1], [0, 0, 1, 1], [], []>} : vector<8x40xf32>, vector<40x20xf32>, vector<8x20xf32> -> vector<8x20xf32>
    %c0_5 = arith.constant 0 : index
    %c0_6 = arith.constant 0 : index
    %5 = vector.load %arg4[%c0_5, %c0_6] : memref<1x20xf32, #tpu.memory_space<vmem>>, vector<1x20xf32>
    %6 = vector.broadcast %5 : vector<1x20xf32> to vector<8x20xf32>
    %7 = arith.addf %4, %6 : vector<8x20xf32>
    %8 = vector.extract_strided_slice %7 {offsets = [0, 0], sizes = [8, 10], strides = [1, 1]} : vector<8x20xf32> to vector<8x10xf32>
    %9 = vector.extract_strided_slice %7 {offsets = [0, 10], sizes = [8, 10], strides = [1, 1]} : vector<8x20xf32> to vector<8x10xf32>
    %10 = arith.mulf %8, %9 : vector<8x10xf32>
    %cst_7 = arith.constant dense<0.000000e+00> : vector<8xf32>
    %11 = vector.multi_reduction <add>, %10, %cst_7 [1] : vector<8x10xf32> to vector<8xf32>
    %12 = vector.shape_cast %11 : vector<8xf32> to vector<8x1xf32>
    %13 = tpu.transpose %12, [1, 0] : vector<8x1xf32> -> vector<1x8xf32>
    %c0_8 = arith.constant 0 : index
    %c0_9 = arith.constant 0 : index
    %14 = vector.load %arg5[%c0_8, %c0_9] : memref<1x8xf32, #tpu.memory_space<vmem>>, vector<1x8xf32>
    tpu.vector_store %arg5[%c0_8, %c0_9], %13 {strides = array<i32>} : memref<1x8xf32, #tpu.memory_space<vmem>>, vector<1x8xf32>,
    return
  }
  func.func @transform_0(%arg0: i32) -> (i32, i32) {
    %c0_i32 = arith.constant 0 : i32
    %c0_i32_0 = arith.constant 0 : i32
    return %arg0, %c0_i32 : i32, i32
  }
  func.func @transform_1(%arg0: i32) -> (i32, i32) {
    %c0_i32 = arith.constant 0 : i32
    %c0_i32_0 = arith.constant 0 : i32
    return %arg0, %c0_i32 : i32, i32
  }
  func.func @transform_2(%arg0: i32) -> (i32, i32) {
    %c0_i32 = arith.constant 0 : i32
    %c0_i32_0 = arith.constant 0 : i32
    %c0_i32_1 = arith.constant 0 : i32
    return %c0_i32, %c0_i32_0 : i32, i32
  }
  func.func @transform_3(%arg0: i32) -> (i32, i32) {
    %c0_i32 = arith.constant 0 : i32
    %c0_i32_0 = arith.constant 0 : i32
    %c0_i32_1 = arith.constant 0 : i32
    return %c0_i32, %c0_i32_0 : i32, i32
  }
  func.func @transform_4(%arg0: i32) -> (i32, i32) {
    %c0_i32 = arith.constant 0 : i32
    %c0_i32_0 = arith.constant 0 : i32
    return %c0_i32, %arg0 : i32, i32
  }
}

module attributes {stable_mosaic.version = 11 : i64} {
  func.func @kernel(%arg0: i32, %arg1: memref<8x16xf32, #tpu.memory_space<vmem>>, %arg2: memref<8x24xf32, #tpu.memory_space<vmem>>, %arg3: memref<40x20xf32, #tpu.memory_space<vmem>>, %arg4: memref<1x20xf32, #tpu.memory_space<vmem>>, %arg5: memref<1x8xf32, #tpu.memory_space<vmem>>) attributes {dimension_semantics = [#tpu.dimension_semantics<parallel>], iteration_bounds = array<i64: 1>, scalar_prefetch = 0 : i64, scratch_operands = 0 : i64, tpu.core_type = #tpu.core_type<tc>, window_params = [{transform_indices = @transform_0, window_bounds = array<i64: 8, 16>}, {transform_indices = @transform_1, window_bounds = array<i64: 8, 24>}, {pipeline_mode = #tpu.pipeline_mode<synchronous>, transform_indices = @transform_2, window_bounds = array<i64: 40, 20>}, {pipeline_mode = #tpu.pipeline_mode<synchronous>, transform_indices = @transform_3, window_bounds = array<i64: 1, 20>}, {transform_indices = @transform_4, window_bounds = array<i64: 1, 8>}]} {
    %c0 = arith.constant 0 : index
    %c0_0 = arith.constant 0 : index
    %0 = vector.load %arg1[%c0, %c0_0] : memref<8x16xf32, #tpu.memory_space<vmem>>, vector<8x16xf32>
    %c0_1 = arith.constant 0 : index
    %c0_2 = arith.constant 0 : index
    %1 = vector.load %arg3[%c0_1, %c0_2] : memref<40x20xf32, #tpu.memory_space<vmem>>, vector<16x10xf32>
    %cst = arith.constant dense<0.000000e+00> : vector<8x10xf32>
    %2 = tpu.matmul %0, %1, %cst {dimension_numbers = #tpu.dot_dimension_numbers<[1], [0], [0], [1], [0, 0, 1, 1], [], []>} : vector<8x16xf32>, vector<16x10xf32>, vector<8x10xf32> -> vector<8x10xf32>
    %c0_3 = arith.constant 0 : index
    %c0_4 = arith.constant 0 : index
    %3 = vector.load %arg4[%c0_3, %c0_4] : memref<1x20xf32, #tpu.memory_space<vmem>>, vector<1x10xf32>
    %4 = vector.broadcast %3 : vector<1x10xf32> to vector<8x10xf32>
    %5 = arith.addf %2, %4 : vector<8x10xf32>
    %c0_5 = arith.constant 0 : index
    %c0_6 = arith.constant 0 : index
    %6 = vector.load %arg2[%c0_5, %c0_6] : memref<8x24xf32, #tpu.memory_space<vmem>>, vector<8x24xf32>
    %c16 = arith.constant 16 : index
    %c10 = arith.constant 10 : index
    %7 = vector.load %arg3[%c16, %c10] : memref<40x20xf32, #tpu.memory_space<vmem>>, vector<24x10xf32>
    %cst_7 = arith.constant dense<0.000000e+00> : vector<8x10xf32>
    %8 = tpu.matmul %6, %7, %cst_7 {dimension_numbers = #tpu.dot_dimension_numbers<[1], [0], [0], [1], [0, 0, 1, 1], [], []>} : vector<8x24xf32>, vector<24x10xf32>, vector<8x10xf32> -> vector<8x10xf32>
    %c0_8 = arith.constant 0 : index
    %c10_9 = arith.constant 10 : index
    %9 = vector.load %arg4[%c0_8, %c10_9] : memref<1x20xf32, #tpu.memory_space<vmem>>, vector<1x10xf32>
    %10 = vector.broadcast %9 : vector<1x10xf32> to vector<8x10xf32>
    %11 = arith.addf %8, %10 : vector<8x10xf32>
    %12 = arith.mulf %5, %11 : vector<8x10xf32>
    %cst_10 = arith.constant dense<0.000000e+00> : vector<8xf32>
    %13 = vector.multi_reduction <add>, %12, %cst_10 [1] : vector<8x10xf32> to vector<8xf32>
    %14 = vector.shape_cast %13 : vector<8xf32> to vector<8x1xf32>
    %15 = tpu.transpose %14, [1, 0] : vector<8x1xf32> -> vector<1x8xf32>
    %c0_11 = arith.constant 0 : index
    %c0_12 = arith.constant 0 : index
    %16 = vector.load %arg5[%c0_11, %c0_12] : memref<1x8xf32, #tpu.memory_space<vmem>>, vector<1x8xf32>
    tpu.vector_store %arg5[%c0_11, %c0_12], %15 {strides = array<i32>} : memref<1x8xf32, #tpu.memory_space<vmem>>, vector<1x8xf32>,
    return
  }
  func.func @transform_0(%arg0: i32) -> (i32, i32) {
    %c0_i32 = arith.constant 0 : i32
    %c0_i32_0 = arith.constant 0 : i32
    return %arg0, %c0_i32 : i32, i32
  }
  func.func @transform_1(%arg0: i32) -> (i32, i32) {
    %c0_i32 = arith.constant 0 : i32
    %c0_i32_0 = arith.constant 0 : i32
    return %arg0, %c0_i32 : i32, i32
  }
  func.func @transform_2(%arg0: i32) -> (i32, i32) {
    %c0_i32 = arith.constant 0 : i32
    %c0_i32_0 = arith.constant 0 : i32
    %c0_i32_1 = arith.constant 0 : i32
    return %c0_i32, %c0_i32_0 : i32, i32
  }
  func.func @transform_3(%arg0: i32) -> (i32, i32) {
    %c0_i32 = arith.constant 0 : i32
    %c0_i32_0 = arith.constant 0 : i32
    %c0_i32_1 = arith.constant 0 : i32
    return %c0_i32, %c0_i32_0 : i32, i32
  }
  func.func @transform_4(%arg0: i32) -> (i32, i32) {
    %c0_i32 = arith.constant 0 : i32
    %c0_i32_0 = arith.constant 0 : i32
    return %c0_i32, %arg0 : i32, i32
  }
}

</mosaic_0001>

<bundles_post_ra>
// kernel: tpu_custom_call.1
= control target key start
LH: loop header
LB: loop body
LE: loop exit
PB: predicated region body
PF: predicated region fallthrough
CT: control target
= control target key end

     0   :  { %s217_s19 = smov 16   ;;  %v218_v2 = vmov 0.0   ;;  %vm219_vm0 = vmmov 0   ;;  %s274_s0 = inlined_call_operand.vmem [shape: f32[8,16], index: 0, kind: input, shape index: {}]   ;;  %s275_s1 = inlined_call_operand.vmem [shape: f32[8,24], index: 1, kind: input, shape index: {}]   ;;  %s276_s2 = inlined_call_operand.vmem [shape: f32[40,20], index: 2, kind: input, shape index: {}]   ;;  %s277_s3 = inlined_call_operand.vmem [shape: f32[1,20], index: 3, kind: input, shape index: {}]   ;;  %s278_s4 = inlined_call_operand.hbm [shape: f32[1,8], index: 4, kind: output, shape index: {}]  }
   0x1   :  { %v19_v0 = vld [vmem:[%s275_s1] sm:$0xff]  ;;  %177 = vmatprep.subr.mxu0 %v218_v2  ;;  %v29_v3 = vld [vmem:[%s276_s2 + $0x18] sm:$0xff]  ;;  %187 = vmatprep.mubr.msk.f32.mxu0 %vm219_vm0, %v218_v2 }
   0x2   :  { %v30_v1 = vld [vmem:[%s276_s2 + $0x20] sm:$0xff]  ;;  %21 = vrot.lane.b32.xlu0 %v19_v0, %s217_s19 }
   0x3   :  { %178 = vmatpush3.msra.mxu0 %v30_v1 }
   0x4   :  { %9 = vsyncpa [#allocation3], 0  ;;  %179 = vmatprep.subr.mxu0 %v218_v2  ;;  %v28_v4 = vld [vmem:[%s276_s2 + $0x10] sm:$0xff]  ;;  %v27_v5 = vld [vmem:[%s276_s2 + $0x8] sm:$0xff]  ;;  %vm24_vm1 = vcmask 130048   ;;  %vm38_vm2 = vcmask 326656  }
   0x5   :  { %180 = vmatpush3.msra.mxu0 %v29_v3  ;;  %v26_v6 = vld [vmem:[%s276_s2] sm:$0xff]  ;;  %s220_s2 = smov 118   ;;  %vm117_vm3 = vcmask 80896   ;;  %vm153_vm4 = vcmask 57344  }
   0x6   :  { %181 = vmatprep.subr.mxu0 %v218_v2  ;;  %v18_v7 = vld [vmem:[%s274_s0] sm:$0xff]  ;;  %s221_s0 = smov [#allocation2]  }
   0x7   :  { %182 = vmatpush3.msra.mxu0 %v28_v4  ;;  %v169_v10 = vld [vmem:[%s277_s3] ss:$0 sm:$0xff]  ;;  %s161_s5 = sshll.u32 %s221_s0, 4  ;;  %s162_s5 = int_to_ptr.vmem [resolvable:$true] %s161_s5 }
   0x8   :  { %183 = vmatprep.subr.mxu0 %v218_v2  ;;  %s195_s6 = scalar_lea.vmem %s162_s5, 16  ;;  %s199_s3 = scalar_lea.vmem %s162_s5, 32 }
   0x9   :  { %184 = vmatpush3.msra.mxu0 %v27_v5  ;;  %p196_p0 = scmp.ne.s32.totalorder %s162_s5, %s195_s6  ;;  %p200_p1 = scmp.lt.s32.totalorder %s162_s5, %s162_s5 }
   0xa   :  { %185 = vmatprep.subr.mxu0 %v218_v2  ;;  %p201_p2 = scmp.lt.s32.totalorder %s199_s3, %s195_s6 }
   0xb   :  { %186 = vmatpush3.msra.mxu0 %v26_v6 }
   0xc   :  { %p202_p3 = por %p201_p2, %p200_p1 }
   0xe   :  { %p203_p4 = pnand %p202_p3, %p196_p0 }
  0x74   :  { %v22_v8 = vpop.permute.xlu0 %21 }
  0x75   :  { %v25_v9 = vsel %vm24_vm1, %v18_v7, %v22_v8 }
  0x76   :  { %188 = vmatmul.mubr.msk.f32.vlgmr.msra.gmra.mxu0 %vm38_vm2, %v25_v9 }
 0x136   :  { %v108_v11 = vpop.f32.mrf.mxu0 }
 0x137   :  { %v109_v12 = vadd.f32 %v169_v10, %v108_v11 }
 0x138   :  { %v189_v13 = vpop.f32.mrf.mxu0 }
 0x139   :  { %113 = vrot.lane.b32.xlu0 %v109_v12, %s220_s2 }
 0x1ab   :  { %v114_v14 = vpop.permute.xlu0 %113 }
 0x1ac   :  { %v116_v15 = vmul.f32 %v114_v14, %v109_v12 }
 0x1ae   :  { %v118_v16 = vsel %vm117_vm3, %v116_v15, 0.0 }
 0x1af   :  { %119 = vadd.xlane.f32.xlu1 %v118_v16 }
 0x238   :  { %v120_v17 = vpop.xlane.xlu1 %119 }
 0x239   :  { %121 = vxpose.xlu1.b32.start.end [1/1] (short) (narrow) %v120_v17, 8 }
 0x2b5   :  { %v137_v18 = vpop.trf.xlu1 }
 0x2b6   :  { %154 = vst.msk [vmem:[#allocation2] sm:$0x1] %vm153_vm4, %v137_v18 }
 0x2b7   :  { %206 = shalt.err (!%p203_p4)
}
 0x2b8   :  { %164 = dma.vmem_to_hbm [thread:$0]  %s162_s5, 16, %s278_s4, [#allocation3]  }
 0x2b9   :  { %215 = dma.done.wait [#allocation3], 16  }
 0x2ba   :  { %216 = vsyncadd [#allocation3], 4294967280 }
 0x2bb   :  { %168 = vsyncpa [#allocation3], 1 }

// kernel: tpu_custom_call.1
= control target key start
LH: loop header
LB: loop body
LE: loop exit
PB: predicated region body
PF: predicated region fallthrough
CT: control target
= control target key end

     0   :  { %s300_s19 = smov 118   ;;  %v301_v4 = vmov 0.0   ;;  %vm302_vm0 = vmmov 0   ;;  %vm28_vm1 = vcmask 130048   ;;  %s356_s0 = inlined_call_operand.vmem [shape: f32[8,16], index: 0, kind: input, shape index: {}]   ;;  %s357_s1 = inlined_call_operand.vmem [shape: f32[8,24], index: 1, kind: input, shape index: {}]   ;;  %s358_s2 = inlined_call_operand.vmem [shape: f32[40,20], index: 2, kind: input, shape index: {}]   ;;  %s359_s3 = inlined_call_operand.vmem [shape: f32[1,20], index: 3, kind: input, shape index: {}]   ;;  %s360_s4 = inlined_call_operand.hbm [shape: f32[1,8], index: 4, kind: output, shape index: {}]  }
   0x1   :  { %v105_v0 = vld [vmem:[%s358_s2 + $0x20] sm:$0xff]  ;;  %v103_v1 = vld [vmem:[%s358_s2 + $0x10] sm:$0xff]  ;;  %v20_v2 = vld [vmem:[%s358_s2 + $0x8] sm:$0xff]  ;;  %265 = vmatprep.subr.mxu1 %v301_v4  ;;  %258 = vmatprep.subr.mxu0 %v301_v4 }
   0x2   :  { %113 = vrot.lane.b32.xlu0 %v105_v0, %s300_s19  ;;  %109 = vrot.lane.b32.xlu1 %v103_v1, %s300_s19  ;;  %v104_v3 = vld [vmem:[%s358_s2 + $0x18] sm:$0xff]  ;;  %v19_v5 = vld [vmem:[%s358_s2] sm:$0xff] }
   0x3   :  { %259 = vmatpush3.msra.mxu0 %v20_v2  ;;  %262 = vmatprep.mubr.msk.f32.mxu0 %vm302_vm0, %v301_v4  ;;  %v18_v6 = vld [vmem:[%s356_s0] sm:$0xff] }
   0x4   :  { %v248_v7 = vld [vmem:[%s359_s3] ss:$0 sm:$0xff] }
   0x5   :  { %9 = vsyncpa [#allocation3], 0  ;;  %260 = vmatprep.subr.mxu0 %v301_v4  ;;  %271 = vmatprep.mubr.msk.f32.mxu1 %vm302_vm0, %v301_v4  ;;  %v102_v11 = vld [vmem:[%s357_s1] sm:$0xff]  ;;  %vm121_vm2 = vcmask 195584   ;;  %vm196_vm3 = vcmask 80896   ;;  %s303_s3 = smov [#allocation2]  }
   0x6   :  { %111 = vrot.lane.b32.xlu0 %v104_v3, %s300_s19  ;;  %261 = vmatpush3.msra.mxu0 %v19_v5  ;;  %s240_s30 = sshll.u32 %s303_s3, 4  ;;  %vm232_vm4 = vcmask 57344   ;;  %s241_s30 = int_to_ptr.vmem [resolvable:$true] %s240_s30 }
   0x7   :  { %263 = vmatmul.mubr.msk.f32.vlgmr.msra.gmra.mxu0 %vm28_vm1, %v18_v6  ;;  %118 = vrot.lane.b32.xlu1 %v248_v7, %s300_s19  ;;  %s278_s1 = scalar_lea.vmem %s241_s30, 16  ;;  %s282_s5 = scalar_lea.vmem %s241_s30, 32 }
   0x8   :  { %p279_p0 = scmp.ne.s32.totalorder %s241_s30, %s278_s1  ;;  %p283_p1 = scmp.lt.s32.totalorder %s241_s30, %s241_s30 }
   0x9   :  { %p284_p2 = scmp.lt.s32.totalorder %s282_s5, %s278_s1 }
   0xb   :  { %p285_p3 = por %p284_p2, %p283_p1 }
   0xd   :  { %p286_p4 = pnand %p285_p3, %p279_p0 }
  0x74   :  { %v114_v8 = vpop.permute.xlu0 %113  ;;  %v110_v10 = vpop.permute.xlu1 %109 }
  0x75   :  { %266 = vmatpush3.msra.mxu1 %v114_v8 }
  0x76   :  { %267 = vmatprep.subr.mxu1 %v301_v4 }
  0x78   :  { %v112_v9 = vpop.permute.xlu0 %111 }
  0x79   :  { %268 = vmatpush3.msra.mxu1 %v112_v9  ;;  %v119_v14 = vpop.permute.xlu1 %118 }
  0x7a   :  { %269 = vmatprep.subr.mxu1 %v301_v4 }
  0x7b   :  { %270 = vmatpush3.msra.mxu1 %v110_v10 }
  0x7c   :  { %272 = vmatmul.mubr.msk.f32.vlgmr.msra.gmra.mxu1 %vm121_vm2, %v102_v11 }
  0xc7   :  { %v98_v12 = vpop.f32.mrf.mxu0 }
  0xc8   :  { %v99_v15 = vadd.f32 %v248_v7, %v98_v12 }
  0xc9   :  { %v264_v13 = vpop.f32.mrf.mxu0 }
 0x13c   :  { %v191_v16 = vpop.f32.mrf.mxu1 }
 0x13d   :  { %v192_v17 = vadd.f32 %v191_v16, %v119_v14 }
 0x13e   :  { %v273_v18 = vpop.f32.mrf.mxu1 }
 0x13f   :  { %v195_v19 = vmul.f32 %v192_v17, %v99_v15 }
 0x141   :  { %v197_v20 = vsel %vm196_vm3, %v195_v19, 0.0 }
 0x142   :  { %198 = vadd.xlane.f32.xlu0 %v197_v20 }
 0x1cb   :  { %v199_v21 = vpop.xlane.xlu0 %198 }
 0x1cc   :  { %200 = vxpose.xlu1.b32.start.end [1/1] (short) (narrow) %v199_v21, 8 }
 0x248   :  { %v216_v22 = vpop.trf.xlu1 }
 0x249   :  { %233 = vst.msk [vmem:[#allocation2] sm:$0x1] %vm232_vm4, %v216_v22 }
 0x24a   :  { %289 = shalt.err (!%p286_p4)
}
 0x24b   :  { %243 = dma.vmem_to_hbm [thread:$0]  %s241_s30, 16, %s360_s4, [#allocation3]  }
 0x24c   :  { %298 = dma.done.wait [#allocation3], 16  }
 0x24d   :  { %299 = vsyncadd [#allocation3], 4294967280 }
 0x24e   :  { %247 = vsyncpa [#allocation3], 1 }

</bundles_post_ra>
